<compile_context>
chip_gen: v7x
topology: tpu7x:2x2x1
jax: 0.10.0
libtpu: 0.0.40
codegen_flags: <defaults>
</compile_context>

<pallas_src>
import jax
import jax.numpy as jnp
from jax.experimental import pallas as pl
from jax.experimental.pallas import tpu as pltpu


def _rup(x, m=128):
    return ((x + m - 1) // m) * m


# ---------------------------------------------------------------------------
# Kernel
# ---------------------------------------------------------------------------
def _make_kernel(dims):
    LPAD, GHP, HP, NP, OW = dims["LPAD"], dims["GHP"], dims["HP"], dims["NP"], dims["OW"]
    offs = dims["offs"]  # name -> (row_offset, rows_used, cols_used), all static ints

    def kernel(x_ref, w_ref, v_ref, out_ref):
        f32 = jnp.float32
        bf16 = jnp.bfloat16

        def W(name):
            o, rows, cols = offs[name]
            return w_ref[o:o + rows, :cols]          # static slice of the bf16 weight slab

        V = v_ref[...]                                # [8, WPAD] f32 bias/scale slab
        b1 = V[0:1, :LPAD]
        scale = V[1:2, :GHP]
        shift = V[2:3, :GHP]
        ab1 = V[3:4, :HP]
        ab2 = V[4:5, :NP]
        fb1 = V[5:6, :HP]
        fb2 = V[6:7, :OW]

        x = x_ref[...].astype(bf16)                   # [tb, KD] (unpadded-ish input)

        # per-modality Linear -> ReLU -> Linear, as block-diagonal matmuls on the concat
        h1 = jnp.maximum(
            jnp.dot(x, W("W1"), preferred_element_type=f32) + b1, 0.0)          # [tb, LPAD]
        cat = jnp.dot(h1.astype(bf16), W("W2"), preferred_element_type=f32)     # [tb, GHP]

        # BatchNorm1d (eval, running stats) folded to scale/shift (proj bias-2 folded in)
        norm = cat * scale + shift                                               # [tb, GHP]

        # attention MLP + softmax over modalities (padded lanes biased to -1e30 -> exp==0)
        a1 = jnp.maximum(
            jnp.dot(norm.astype(bf16), W("AW1"), preferred_element_type=f32) + ab1, 0.0)
        logits = jnp.dot(a1.astype(bf16), W("AW2"), preferred_element_type=f32) + ab2
        m = jnp.max(logits, axis=-1, keepdims=True)
        e = jnp.exp(logits - m)
        w_h = e * pl.reciprocal(jnp.sum(e, axis=-1, keepdims=True), approx=True)  # [tb, NP]
        w_hb = w_h.astype(bf16)

        # modality-weighted sum (fusion == 'sum'): w_h @ S broadcasts each modality weight
        # across its hidden lanes; FW1 is tile(fw1, n) so the first fusion matmul also sums
        # the n chunks.
        w_full = jnp.dot(w_hb, W("S"), preferred_element_type=f32)               # [tb, GHP]
        weighted = (w_full * norm).astype(bf16)

        # fusion MLP: Linear -> ReLU -> (Dropout=id) -> Linear -> ReLU -> (Dropout=id)
        f1 = jnp.maximum(
            jnp.dot(weighted, W("FW1"), preferred_element_type=f32) + fb1, 0.0)
        out = jnp.maximum(
            jnp.dot(f1.astype(bf16), W("FW2"), preferred_element_type=f32) + fb2, 0.0)

        # merge w_h into the zero-padded lanes [output_dim : output_dim+n] of the out slab
        out = out + jnp.dot(w_hb, W("P"), preferred_element_type=f32)
        out_ref[...] = out.astype(out_ref.dtype)      # one dense 128-lane-multiple store

    return kernel


# ---------------------------------------------------------------------------
# One-time parameter packing (hoisted out of the per-call path)
# ---------------------------------------------------------------------------
def pack_params(params, input_dims, hidden_dim, output_dim, eps=1e-5):
    f32 = jnp.float32
    n = len(input_dims)
    H = hidden_dim
    sum_d = sum(int(d) for d in input_dims)
    KD = ((sum_d + 7) // 8) * 8                       # input lanes, rounded to sublane
    GH = n * H
    LPAD, GHP, HP, NP = _rup(sum_d), _rup(GH), _rup(H), 128
    OW = _rup(output_dim + n)                         # merged output slab width
    WPAD = max(LPAD, GHP, HP, NP, OW)

    # segment layout of the packed weight slab (rows allocated in 128-multiples)
    order = [("W1", KD, LPAD), ("W2", LPAD, GHP), ("AW1", GHP, HP), ("AW2", HP, NP),
             ("S", NP, GHP), ("FW1", GHP, HP), ("FW2", HP, OW), ("P", NP, OW)]
    offs, total_rows = {}, 0
    for name, rows, cols in order:
        offs[name] = (total_rows, rows, cols)
        total_rows += _rup(rows)

    # --- block-diagonal projection weights ---
    W1 = jnp.zeros((KD, LPAD), f32)
    b1 = jnp.zeros((LPAD,), f32)
    W2 = jnp.zeros((LPAD, GHP), f32)
    b2 = jnp.zeros((GH,), f32)
    off = 0
    for i, d in enumerate(input_dims):
        pw1, pb1, pw2, pb2 = params["proj"][i]
        W1 = W1.at[off:off + d, off:off + d].set(pw1.astype(f32))
        b1 = b1.at[off:off + d].set(pb1.reshape(-1).astype(f32))
        W2 = W2.at[off:off + d, i * H:(i + 1) * H].set(pw2.astype(f32))
        b2 = b2.at[i * H:(i + 1) * H].set(pb2.reshape(-1).astype(f32))
        off += d

    # --- BatchNorm (eval) folded into scale/shift; fold projection bias 2 into shift ---
    gamma = params["gamma"].reshape(-1).astype(f32)
    beta = params["beta"].reshape(-1).astype(f32)
    rmean = params["rmean"].reshape(-1).astype(f32)
    rvar = params["rvar"].reshape(-1).astype(f32)
    scale = gamma * jax.lax.rsqrt(rvar + eps)
    shift = beta + (b2 - rmean) * scale

    # --- selector matrices ---
    j = jnp.arange(GH)
    S = jnp.zeros((NP, GHP), f32).at[j // H, j].set(1.0)      # modality-weight broadcast
    jn = jnp.arange(n)
    P = jnp.zeros((NP, OW), f32).at[jn, output_dim + jn].set(1.0)  # w_h lane placement

    fw1_tiled = jnp.tile(params["fw1"].astype(f32), (n, 1))    # [GH, H]

    mats = {"W1": W1, "W2": W2,
            "AW1": params["aw1"].astype(f32), "AW2": params["aw2"].astype(f32),
            "S": S, "FW1": fw1_tiled, "FW2": params["fw2"].astype(f32), "P": P}

    wslab = jnp.zeros((total_rows, WPAD), f32)
    for name, _, _ in order:
        o, _, _ = offs[name]
        m = mats[name]
        wslab = wslab.at[o:o + m.shape[0], :m.shape[1]].set(m)
    wslab = wslab.astype(jnp.bfloat16)                         # bf16 weight slab in HBM

    def padv(v, fill=0.0):
        out = jnp.full((WPAD,), fill, f32)
        flat = v.reshape(-1).astype(f32)
        return out.at[:flat.shape[0]].set(flat)

    vslab = jnp.stack([
        b1 if LPAD == WPAD else padv(b1),
        padv(scale), padv(shift),
        padv(params["ab1"]),
        padv(params["ab2"], fill=-1e30),    # padded modality lanes -> exp() == 0
        padv(params["fb1"]), padv(params["fb2"]),
        jnp.zeros((WPAD,), f32),
    ], axis=0)                                                  # [8, WPAD] f32

    dims = dict(KD=KD, LPAD=LPAD, GHP=GHP, HP=HP, NP=NP, OW=OW, WPAD=WPAD,
                offs=offs, sum_d=sum_d, n=n, output_dim=int(output_dim))
    return {"wslab": wslab, "vslab": vslab, "dims": dims}


def _pick_tb(batch, max_tb=1024):
    # >=2 grid steps whenever possible (keeps both v7x TensorCores busy), tile a multiple
    # of 8, capped so per-step VMEM stays small; the wrapper pads the batch tail.
    if batch <= 8:
        return 8
    n_steps = max(2, -(-batch // max_tb))
    return ((-(-batch // n_steps) + 7) // 8) * 8


# ---------------------------------------------------------------------------
# Public wrapper (hot path: concat + pallas_call + slice)
# ---------------------------------------------------------------------------
def modal_weighted_fusion(features, packed, *, tb=None):
    """features: list of [B, d_i] arrays; packed: result of pack_params().
    Returns (out [B, output_dim], w_h [B, n])."""
    dims = packed["dims"]
    KD, OW = dims["KD"], dims["OW"]
    n, output_dim, sum_d = dims["n"], dims["output_dim"], dims["sum_d"]

    B = features[0].shape[0]
    xcat = jnp.concatenate([f.astype(jnp.float32) for f in features], axis=-1)

    if tb is None:
        tb = _pick_tb(B)
    Bp = -(-B // tb) * tb
    pad_r, pad_c = Bp - B, KD - sum_d
    if pad_r or pad_c:
        xcat = jnp.pad(xcat, ((0, pad_r), (0, pad_c)))

    kernel = _make_kernel(dims)
    out_pad = pl.pallas_call(
        kernel,
        grid=(Bp // tb,),
        in_specs=[
            pl.BlockSpec((tb, KD), lambda b: (b, 0)),            # batch-tiled input
            pl.BlockSpec(packed["wslab"].shape, lambda b: (0, 0)),  # bf16 weight slab
            pl.BlockSpec(packed["vslab"].shape, lambda b: (0, 0)),  # f32 bias/scale slab
        ],
        out_specs=pl.BlockSpec((tb, OW), lambda b: (b, 0)),      # merged out + w_h slab
        out_shape=jax.ShapeDtypeStruct((Bp, OW), jnp.float32),
        compiler_params=pltpu.CompilerParams(
            dimension_semantics=("parallel",)),
    )(xcat, packed["wslab"], packed["vslab"])

    out = out_pad[:B, :output_dim]
    w_h = out_pad[:B, output_dim:output_dim + n]
    return out, w_h


# ---------------------------------------------------------------------------
# Pure-JAX reference (eval-mode semantics of the PyTorch module)
# ---------------------------------------------------------------------------
def reference_forward(features, params, *, hidden_dim, eps=1e-5):
    hs = []
    for i, x in enumerate(features):
        pw1, pb1, pw2, pb2 = params["proj"][i]
        h1 = jnp.maximum(x @ pw1 + pb1, 0.0)
        hs.append(h1 @ pw2 + pb2)
    concat = jnp.concatenate(hs, axis=-1)
    norm = ((concat - params["rmean"]) * jax.lax.rsqrt(params["rvar"] + eps)
            * params["gamma"] + params["beta"])
    a1 = jnp.maximum(norm @ params["aw1"] + params["ab1"], 0.0)
    logits = a1 @ params["aw2"] + params["ab2"]
    w_h = jax.nn.softmax(logits, axis=-1)
    y = 0.0
    for i in range(len(features)):
        y = y + w_h[:, i:i + 1] * norm[:, i * hidden_dim:(i + 1) * hidden_dim]
    f1 = jnp.maximum(y @ params["fw1"] + params["fb1"], 0.0)
    out = jnp.maximum(f1 @ params["fw2"] + params["fb2"], 0.0)
    return out, w_h


def init_params(key, input_dims, hidden_dim, output_dim):
    num_modal = len(input_dims)
    total = num_modal * hidden_dim
    keys = iter(jax.random.split(key, 64))

    def lin(k, din, dout, scale=0.1):
        kw, kb = jax.random.split(k)
        w = scale * jax.random.normal(kw, (din, dout), jnp.float32)
        b = scale * jax.random.normal(kb, (1, dout), jnp.float32)
        return w, b

    proj = []
    for d in input_dims:
        w1, b1 = lin(next(keys), d, d)
        w2, b2 = lin(next(keys), d, hidden_dim)
        proj.append((w1, b1, w2, b2))

    params = {"proj": proj}
    params["gamma"] = 1.0 + 0.1 * jax.random.normal(next(keys), (1, total), jnp.float32)
    params["beta"] = 0.1 * jax.random.normal(next(keys), (1, total), jnp.float32)
    params["rmean"] = 0.05 * jax.random.normal(next(keys), (1, total), jnp.float32)
    params["rvar"] = 0.5 + jax.random.uniform(next(keys), (1, total), jnp.float32)

    params["aw1"], params["ab1"] = lin(next(keys), total, hidden_dim)
    params["aw2"], params["ab2"] = lin(next(keys), hidden_dim, num_modal)
    params["fw1"], params["fb1"] = lin(next(keys), hidden_dim, hidden_dim)
    params["fw2"], params["fb2"] = lin(next(keys), hidden_dim, output_dim)
    return params


if __name__ == "__main__":
    # Small shapes consistent with the module: 2 modalities with feature dims (16, 24),
    # hidden_dim=32, output_dim=32, batch=16, fusion='sum'.
    input_dims = (16, 24)
    hidden_dim = 32
    output_dim = 32
    B = 16

    key = jax.random.PRNGKey(0)
    k_params, k_x0, k_x1 = jax.random.split(key, 3)
    params = init_params(k_params, input_dims, hidden_dim, output_dim)
    features = [
        jax.random.normal(k_x0, (B, input_dims[0]), jnp.float32),
        jax.random.normal(k_x1, (B, input_dims[1]), jnp.float32),
    ]

    # Pack parameters once (hoisted out of the hot path), then run the fused kernel.
    packed = pack_params(params, input_dims, hidden_dim, output_dim)
    out, w_h = modal_weighted_fusion(features, packed)
    out = jax.block_until_ready(out)
    w_h = jax.block_until_ready(w_h)

    ref_out, ref_wh = reference_forward(features, params, hidden_dim=hidden_dim)
    assert out.shape == (B, output_dim) and w_h.shape == (B, len(input_dims))
    # bf16 matmul operands (f32 accumulation / elementwise) -> loosened tolerances.
    assert jnp.allclose(out, ref_out, atol=5e-2, rtol=5e-2)
    assert jnp.allclose(w_h, ref_wh, atol=3e-2)

    print("KERNEL_OK")
</pallas_src>

<mosaic_0001>
module attributes {stable_mosaic.version = 11 : i64} {
  func.func @kernel(%arg0: i32, %arg1: memref<8x40xf32, #tpu.memory_space<vmem>>, %arg2: memref<1024x128xbf16, #tpu.memory_space<vmem>>, %arg3: memref<8x128xf32, #tpu.memory_space<vmem>>, %arg4: memref<8x128xf32, #tpu.memory_space<vmem>>) attributes {dimension_semantics = [#tpu.dimension_semantics<parallel>], iteration_bounds = array<i64: 2>, scalar_prefetch = 0 : i64, scratch_operands = 0 : i64, tpu.core_type = #tpu.core_type<tc>, window_params = [{transform_indices = @transform_0, window_bounds = array<i64: 8, 40>}, {pipeline_mode = #tpu.pipeline_mode<synchronous>, transform_indices = @transform_1, window_bounds = array<i64: 1024, 128>}, {pipeline_mode = #tpu.pipeline_mode<synchronous>, transform_indices = @transform_2, window_bounds = array<i64: 8, 128>}, {transform_indices = @transform_3, window_bounds = array<i64: 8, 128>}]} {
    %c0 = arith.constant 0 : index
    %c0_0 = arith.constant 0 : index
    %0 = vector.load %arg3[%c0, %c0_0] : memref<8x128xf32, #tpu.memory_space<vmem>>, vector<8x128xf32>
    %1 = vector.extract_strided_slice %0 {offsets = [0, 0], sizes = [1, 128], strides = [1, 1]} : vector<8x128xf32> to vector<1x128xf32>
    %2 = vector.extract_strided_slice %0 {offsets = [1, 0], sizes = [1, 128], strides = [1, 1]} : vector<8x128xf32> to vector<1x128xf32>
    %3 = vector.extract_strided_slice %0 {offsets = [2, 0], sizes = [1, 128], strides = [1, 1]} : vector<8x128xf32> to vector<1x128xf32>
    %4 = vector.extract_strided_slice %0 {offsets = [3, 0], sizes = [1, 128], strides = [1, 1]} : vector<8x128xf32> to vector<1x128xf32>
    %5 = vector.extract_strided_slice %0 {offsets = [4, 0], sizes = [1, 128], strides = [1, 1]} : vector<8x128xf32> to vector<1x128xf32>
    %6 = vector.extract_strided_slice %0 {offsets = [5, 0], sizes = [1, 128], strides = [1, 1]} : vector<8x128xf32> to vector<1x128xf32>
    %7 = vector.extract_strided_slice %0 {offsets = [6, 0], sizes = [1, 128], strides = [1, 1]} : vector<8x128xf32> to vector<1x128xf32>
    %c0_1 = arith.constant 0 : index
    %c0_2 = arith.constant 0 : index
    %8 = vector.load %arg1[%c0_1, %c0_2] : memref<8x40xf32, #tpu.memory_space<vmem>>, vector<8x40xf32>
    %9 = arith.truncf %8 : vector<8x40xf32> to vector<8x40xbf16>
    %c0_3 = arith.constant 0 : index
    %c0_4 = arith.constant 0 : index
    %10 = vector.load %arg2[%c0_3, %c0_4] : memref<1024x128xbf16, #tpu.memory_space<vmem>>, vector<40x128xbf16>
    %cst = arith.constant dense<0.000000e+00> : vector<8x128xf32>
    %11 = tpu.matmul %9, %10, %cst {dimension_numbers = #tpu.dot_dimension_numbers<[1], [0], [0], [1], [0, 0, 1, 1], [], []>} : vector<8x40xbf16>, vector<40x128xbf16>, vector<8x128xf32> -> vector<8x128xf32>
    %12 = vector.broadcast %1 : vector<1x128xf32> to vector<8x128xf32>
    %13 = arith.addf %11, %12 : vector<8x128xf32>
    %cst_5 = arith.constant 0.000000e+00 : f32
    %14 = vector.broadcast %cst_5 : f32 to vector<8x128xf32>
    %15 = arith.maximumf %13, %14 : vector<8x128xf32>
    %16 = arith.truncf %15 : vector<8x128xf32> to vector<8x128xbf16>
    %c128 = arith.constant 128 : index
    %c0_6 = arith.constant 0 : index
    %17 = vector.load %arg2[%c128, %c0_6] : memref<1024x128xbf16, #tpu.memory_space<vmem>>, vector<128x128xbf16>
    %cst_7 = arith.constant dense<0.000000e+00> : vector<8x128xf32>
    %18 = tpu.matmul %16, %17, %cst_7 {dimension_numbers = #tpu.dot_dimension_numbers<[1], [0], [0], [1], [0, 0, 1, 1], [], []>} : vector<8x128xbf16>, vector<128x128xbf16>, vector<8x128xf32> -> vector<8x128xf32>
    %19 = vector.broadcast %2 : vector<1x128xf32> to vector<8x128xf32>
    %20 = arith.mulf %18, %19 : vector<8x128xf32>
    %21 = vector.broadcast %3 : vector<1x128xf32> to vector<8x128xf32>
    %22 = arith.addf %20, %21 : vector<8x128xf32>
    %23 = arith.truncf %22 : vector<8x128xf32> to vector<8x128xbf16>
    %c256 = arith.constant 256 : index
    %c0_8 = arith.constant 0 : index
    %24 = vector.load %arg2[%c256, %c0_8] : memref<1024x128xbf16, #tpu.memory_space<vmem>>, vector<128x128xbf16>
    %cst_9 = arith.constant dense<0.000000e+00> : vector<8x128xf32>
    %25 = tpu.matmul %23, %24, %cst_9 {dimension_numbers = #tpu.dot_dimension_numbers<[1], [0], [0], [1], [0, 0, 1, 1], [], []>} : vector<8x128xbf16>, vector<128x128xbf16>, vector<8x128xf32> -> vector<8x128xf32>
    %26 = vector.broadcast %4 : vector<1x128xf32> to vector<8x128xf32>
    %27 = arith.addf %25, %26 : vector<8x128xf32>
    %cst_10 = arith.constant 0.000000e+00 : f32
    %28 = vector.broadcast %cst_10 : f32 to vector<8x128xf32>
    %29 = arith.maximumf %27, %28 : vector<8x128xf32>
    %30 = arith.truncf %29 : vector<8x128xf32> to vector<8x128xbf16>
    %c384 = arith.constant 384 : index
    %c0_11 = arith.constant 0 : index
    %31 = vector.load %arg2[%c384, %c0_11] : memref<1024x128xbf16, #tpu.memory_space<vmem>>, vector<128x128xbf16>
    %cst_12 = arith.constant dense<0.000000e+00> : vector<8x128xf32>
    %32 = tpu.matmul %30, %31, %cst_12 {dimension_numbers = #tpu.dot_dimension_numbers<[1], [0], [0], [1], [0, 0, 1, 1], [], []>} : vector<8x128xbf16>, vector<128x128xbf16>, vector<8x128xf32> -> vector<8x128xf32>
    %33 = vector.broadcast %5 : vector<1x128xf32> to vector<8x128xf32>
    %34 = arith.addf %32, %33 : vector<8x128xf32>
    %cst_13 = arith.constant dense<0xFF800000> : vector<8xf32>
    %35 = vector.multi_reduction <maximumf>, %34, %cst_13 [1] : vector<8x128xf32> to vector<8xf32>
    %36 = vector.shape_cast %35 : vector<8xf32> to vector<8x1xf32>
    %37 = vector.broadcast %36 : vector<8x1xf32> to vector<8x128xf32>
    %38 = arith.subf %34, %37 : vector<8x128xf32>
    %39 = math.exp %38 : vector<8x128xf32>
    %cst_14 = arith.constant dense<0.000000e+00> : vector<8xf32>
    %40 = vector.multi_reduction <add>, %39, %cst_14 [1] : vector<8x128xf32> to vector<8xf32>
    %41 = vector.shape_cast %40 : vector<8xf32> to vector<8x1xf32>
    %42 = tpu.reciprocal %41 {approx = true} : vector<8x1xf32> -> vector<8x1xf32>
    %43 = vector.broadcast %42 : vector<8x1xf32> to vector<8x128xf32>
    %44 = arith.mulf %39, %43 : vector<8x128xf32>
    %45 = arith.truncf %44 : vector<8x128xf32> to vector<8x128xbf16>
    %c512 = arith.constant 512 : index
    %c0_15 = arith.constant 0 : index
    %46 = vector.load %arg2[%c512, %c0_15] : memref<1024x128xbf16, #tpu.memory_space<vmem>>, vector<128x128xbf16>
    %cst_16 = arith.constant dense<0.000000e+00> : vector<8x128xf32>
    %47 = tpu.matmul %45, %46, %cst_16 {dimension_numbers = #tpu.dot_dimension_numbers<[1], [0], [0], [1], [0, 0, 1, 1], [], []>} : vector<8x128xbf16>, vector<128x128xbf16>, vector<8x128xf32> -> vector<8x128xf32>
    %48 = arith.mulf %47, %22 : vector<8x128xf32>
    %49 = arith.truncf %48 : vector<8x128xf32> to vector<8x128xbf16>
    %c640 = arith.constant 640 : index
    %c0_17 = arith.constant 0 : index
    %50 = vector.load %arg2[%c640, %c0_17] : memref<1024x128xbf16, #tpu.memory_space<vmem>>, vector<128x128xbf16>
    %cst_18 = arith.constant dense<0.000000e+00> : vector<8x128xf32>
    %51 = tpu.matmul %49, %50, %cst_18 {dimension_numbers = #tpu.dot_dimension_numbers<[1], [0], [0], [1], [0, 0, 1, 1], [], []>} : vector<8x128xbf16>, vector<128x128xbf16>, vector<8x128xf32> -> vector<8x128xf32>
    %52 = vector.broadcast %6 : vector<1x128xf32> to vector<8x128xf32>
    %53 = arith.addf %51, %52 : vector<8x128xf32>
    %cst_19 = arith.constant 0.000000e+00 : f32
    %54 = vector.broadcast %cst_19 : f32 to vector<8x128xf32>
    %55 = arith.maximumf %53, %54 : vector<8x128xf32>
    %56 = arith.truncf %55 : vector<8x128xf32> to vector<8x128xbf16>
    %c768 = arith.constant 768 : index
    %c0_20 = arith.constant 0 : index
    %57 = vector.load %arg2[%c768, %c0_20] : memref<1024x128xbf16, #tpu.memory_space<vmem>>, vector<128x128xbf16>
    %cst_21 = arith.constant dense<0.000000e+00> : vector<8x128xf32>
    %58 = tpu.matmul %56, %57, %cst_21 {dimension_numbers = #tpu.dot_dimension_numbers<[1], [0], [0], [1], [0, 0, 1, 1], [], []>} : vector<8x128xbf16>, vector<128x128xbf16>, vector<8x128xf32> -> vector<8x128xf32>
    %59 = vector.broadcast %7 : vector<1x128xf32> to vector<8x128xf32>
    %60 = arith.addf %58, %59 : vector<8x128xf32>
    %cst_22 = arith.constant 0.000000e+00 : f32
    %61 = vector.broadcast %cst_22 : f32 to vector<8x128xf32>
    %62 = arith.maximumf %60, %61 : vector<8x128xf32>
    %c896 = arith.constant 896 : index
    %c0_23 = arith.constant 0 : index
    %63 = vector.load %arg2[%c896, %c0_23] : memref<1024x128xbf16, #tpu.memory_space<vmem>>, vector<128x128xbf16>
    %cst_24 = arith.constant dense<0.000000e+00> : vector<8x128xf32>
    %64 = tpu.matmul %45, %63, %cst_24 {dimension_numbers = #tpu.dot_dimension_numbers<[1], [0], [0], [1], [0, 0, 1, 1], [], []>} : vector<8x128xbf16>, vector<128x128xbf16>, vector<8x128xf32> -> vector<8x128xf32>
    %65 = arith.addf %62, %64 : vector<8x128xf32>
    %c0_25 = arith.constant 0 : index
    %c0_26 = arith.constant 0 : index
    %66 = vector.load %arg4[%c0_25, %c0_26] : memref<8x128xf32, #tpu.memory_space<vmem>>, vector<8x128xf32>
    tpu.vector_store %arg4[%c0_25, %c0_26], %65 {strides = array<i32>} : memref<8x128xf32, #tpu.memory_space<vmem>>, vector<8x128xf32>,
    return
  }
  func.func @transform_0(%arg0: i32) -> (i32, i32) {
    %c0_i32 = arith.constant 0 : i32
    %c0_i32_0 = arith.constant 0 : i32
    return %arg0, %c0_i32 : i32, i32
  }
  func.func @transform_1(%arg0: i32) -> (i32, i32) {
    %c0_i32 = arith.constant 0 : i32
    %c0_i32_0 = arith.constant 0 : i32
    %c0_i32_1 = arith.constant 0 : i32
    return %c0_i32, %c0_i32_0 : i32, i32
  }
  func.func @transform_2(%arg0: i32) -> (i32, i32) {
    %c0_i32 = arith.constant 0 : i32
    %c0_i32_0 = arith.constant 0 : i32
    %c0_i32_1 = arith.constant 0 : i32
    return %c0_i32, %c0_i32_0 : i32, i32
  }
  func.func @transform_3(%arg0: i32) -> (i32, i32) {
    %c0_i32 = arith.constant 0 : i32
    %c0_i32_0 = arith.constant 0 : i32
    return %arg0, %c0_i32 : i32, i32
  }
}

</mosaic_0001>

<bundles_post_ra>
// kernel: tpu_custom_call.1
= control target key start
LH: loop header
LB: loop body
LE: loop exit
PB: predicated region body
PF: predicated region fallthrough
CT: control target
= control target key end

     0   :  { %8 = vsyncpa [#allocation3], 0  ;;  %s2112_s0 = inlined_call_operand.hbm [shape: f32[16,40], index: 0, kind: input, shape index: {}]   ;;  %s2113_s1 = inlined_call_operand.hbm [shape: bf16[1024,128], index: 1, kind: input, shape index: {}]   ;;  %s2114_s2 = inlined_call_operand.hbm [shape: f32[8,128], index: 2, kind: input, shape index: {}]   ;;  %s2115_s3 = inlined_call_operand.hbm [shape: f32[16,128], index: 3, kind: output, shape index: {}]  }
   0x1   :  { %10 = vsyncpa [#allocation3 + $0x1], 0 }
   0x2   :  { %11 = vsyncpa [#allocation6], 0 }
   0x3   :  { %12 = vsyncpa [#allocation4], 0 }
   0x4   :  { %14 = vsyncpa [#allocation4 + $0x1], 0  ;;  %s1781_s12 = smov 0   ;;  %s1783_s13 = smov 0  }
   0x5   :  { %s1785_s14 = smov 0   ;;  %s1787_s15 = smov 0  }
   0x6 LB: > { %s1802_s16 = sadd.s32 4294967295, %s1751_s15   ;;  %s1168_s17 = sadd.s32 4294967294, %s1751_s15   ;;  %s1751_s15 = sphi %s1787_s15, %s2135_s15   ;;  %s1747_s14 = sphi %s1785_s14, %s2134_s14   ;;  %s1743_s13 = sphi %s1783_s13, %s2133_s13   ;;  %s1739_s12 = sphi %s1781_s12, %s2132_s12  }
   0x7   : > { %p40_p0 = scmp.ne.s32.totalorder %s1743_s13, %s1739_s12  ;;  %p2116_p1 = scmp.eq.s32.totalorder %s1802_s16, 0 }
   0x8   : > { %p112_p3 = scmp.eq.s32.totalorder %s1168_s17, 1  ;;  %p1169_p5 = scmp.ge.s32.totalorder %s1751_s15, 1 }
   0x9   : > { %p1811_p4 = por %p2116_p1, %p40_p0  ;;  %p119_p7 = scmp.lt.s32.totalorder %s1751_s15, 3 }
   0xa   : > { %p1816_p6 = por %p112_p3, %p40_p0  ;;  %s1753_s21 = smov [#allocation5]  }
   0xb   : > { %s2119_s18 = scalar_select %p1811_p4, 1, 0 }
   0xc   : > { %s2120_s19 = scalar_select %p1816_p6, 1, 0 }
   0xd   : > { %p1821_p8 = pnand %p1169_p5, %p119_p7  ;;  %s131_s22 = sshll.u32 %s1753_s21, 4  ;;  %s1825_s22 = int_to_ptr.vmem [resolvable:$true] %s131_s22 }
   0xe   : > { %s1754_s24 = smov [#allocation7]   ;;  %s1595_s28 = scalar_lea.hbm %s2113_s1, 8192 }
   0xf   : > { %p1473_p9 = pneg %p1821_p8  ;;  %s145_s25 = sshll.u32 %s1754_s24, 4  ;;  %s1836_s25 = int_to_ptr.vmem [resolvable:$true] %s145_s25 }
  0x10   : > { %p1596_p12 = scmp.ne.s32.totalorder %s2113_s1, %s1595_s28  ;;  %p1602_p5 = scmp.lt.u32.totalorder %s1595_s28, %s2113_s1 }
  0x11   : > { %p1832_p11 = pnand %p1473_p9, %p2116_p1 }
  0x13   : > { %p1597_p13 = pneg %p1832_p11 }
  0x15   : > { %p1598_p0 = pnand %p1597_p13, %p1596_p12 }
  0x17   : > { %p1599_p3 = pneg %p1598_p0 }
  0x19   : > { %p1604_p7 = pnand %p1602_p5, %p1599_p3 }
  0x1b   : > { %1607 = shalt.err (!%p1604_p7)
}
  0x1c   : > { %s1608_s6 = scalar_lea.vmem %s1825_s22, 8192  ;;  %p1616_p2 = scmp.lt.s32.totalorder %s1825_s22, %s1825_s22 }
  0x1d   : > { %p1609_p9 = scmp.ne.s32.totalorder %s1825_s22, %s1608_s6  ;;  %p1617_p12 = scmp.lt.s32.totalorder %s1608_s6, %s1608_s6 }
  0x1f   : > { %p1611_p10 = pnand %p1609_p9, %p1597_p13  ;;  %p1618_p0 = por %p1617_p12, %p1616_p2 }
  0x21   : > { %p1612_p1 = pneg %p1611_p10 }
  0x23   : > { %p1619_p6 = pnand %p1618_p0, %p1612_p1 }
  0x25   : > { %1622 = shalt.err (!%p1619_p6)
}
  0x26   : > { %s1755_s7 = smov 64   ;;  %s1756_s8 = smov 4  }
  0x27   : > { %1476 = dma.hbm_to_vmem [thread:$0]  (!%p1832_p11), %s2113_s1, 8192, %s1825_s22, [#allocation6], %s1755_s7, %s1755_s7, %s1756_s8  }
  0x28   : > { %s1623_s21 = scalar_lea.hbm %s2114_s2, 128 }
  0x29   : > { %p1624_p2 = scmp.ne.s32.totalorder %s2114_s2, %s1623_s21  ;;  %p1630_p10 = scmp.lt.u32.totalorder %s1623_s21, %s2114_s2 }
  0x2b   : > { %p1626_p1 = pnand %p1624_p2, %p1597_p13 }
  0x2d   : > { %p1627_p6 = pneg %p1626_p1 }
  0x2f   : > { %p1632_p3 = pnand %p1630_p10, %p1627_p6 }
  0x31   : > { %1635 = shalt.err (!%p1632_p3)
}
  0x32   : > { %s1636_s22 = scalar_lea.vmem %s1836_s25, 128  ;;  %p1644_p12 = scmp.lt.s32.totalorder %s1836_s25, %s1836_s25 }
  0x33   : > { %p1637_p5 = scmp.ne.s32.totalorder %s1836_s25, %s1636_s22  ;;  %p1645_p0 = scmp.lt.s32.totalorder %s1636_s22, %s1636_s22 }
  0x35   : > { %p1639_p7 = pnand %p1637_p5, %p1597_p13  ;;  %p1646_p2 = por %p1645_p0, %p1644_p12 }
  0x37   : > { %p1640_p9 = pneg %p1639_p7 }
  0x39   : > { %p1647_p1 = pnand %p1646_p2, %p1640_p9 }
  0x3b   : > { %1650 = shalt.err (!%p1647_p1)
}
  0x3c   : > { %1479 = dma.hbm_to_vmem [thread:$0]  (!%p1832_p11), %s2114_s2, 128, %s1836_s25, [#allocation6]  }
  0x3d   : > { %s1891_s4 = sadd.s32 1, %s1751_s15   ;;  %s27_s23 = sadd.s32 1, %s1747_s14 }
  0x3e   : > { %s24_s5 = ssub.s32 %s1751_s15, %s1891_s4  ;;  %p34_p13 = scmp.ne.s32.totalorder %s1747_s14, %s1743_s13 }
  0x3f   : > { %p25_p6 = scmp.eq.s32.totalorder %s24_s5, 0  ;;  %p35_p10 = scmp.eq.s32.totalorder %s1751_s15, 0 }
  0x40   : > { %p2123_p3 = scmp.eq.s32.totalorder %s1802_s16, 1  ;;  %p1490_p7 = scmp.lt.s32.totalorder %s1751_s15, 2 }
  0x41   : > { %s1907_s7 = scalar_select %p25_p6, %s1747_s14, %s27_s23  }
  0x42   : > { %p1901_p5 = por %p2123_p3, %p34_p13  ;;  %p36_p9 = por %p35_p10, %p34_p13 }
  0x43   : > { %s156_s8 = sand.u32 1, %s1747_s14   ;;  %s1174_s25 = sshll.u32 %s1751_s15, 7 }
  0x44   : > { %s2124_s6 = scalar_select %p1901_p5, 1, 0 }
  0x45   : > { %s1173_s9 = sshll.u32 %s156_s8, 3  ;;  %s1914_s17 = scalar_lea.hbm %s2112_s0, %s1174_s25 }
  0x46   : > { %s160_s21 = scalar_lea.vmem [#allocation2], %s1173_s9  ;;  %p1918_p11 = pnand %p1490_p7, %p36_p9 }
  0x47   : > { %s167_s24 = sshll.u32 %s160_s21, 4  ;;  %s157_s27 = scalar_lea.sflag [#allocation3], %s156_s8  ;;  %s1916_s24 = int_to_ptr.vmem [resolvable:$true] %s167_s24 }
  0x48   : > { %s1651_s28 = scalar_lea.hbm %s1914_s17, 128  ;;  %p1653_p0 = pneg %p1918_p11 }
  0x49   : > { %p1652_p12 = scmp.ne.s32.totalorder %s1914_s17, %s1651_s28  ;;  %s1656_s30 = scalar_lea.hbm %s2112_s0, 256 }
  0x4a   : > { %p1657_p13 = scmp.lt.u32.totalorder %s1914_s17, %s2112_s0  ;;  %p1658_p6 = scmp.lt.u32.totalorder %s1656_s30, %s1651_s28 }
  0x4b   : > { %p1654_p2 = pnand %p1653_p0, %p1652_p12  ;;  %p1660_p3 = scmp.lt.u32.totalorder %s1651_s28, %s1914_s17 }
  0x4c   : > { %p1659_p10 = por %p1658_p6, %p1657_p13 }
  0x4d   : > { %p1655_p1 = pneg %p1654_p2 }
  0x4e   : > { %p1661_p7 = por %p1660_p3, %p1659_p10 }
  0x50   : > { %p1662_p9 = pnand %p1661_p7, %p1655_p1 }
  0x52   : > { %1665 = shalt.err (!%p1662_p9)
}
  0x53   : > { %s1666_s8 = scalar_lea.vmem %s1916_s24, 128  ;;  %s1757_s9 = smov [#allocation2]  }
  0x54   : > { %p1667_p12 = scmp.ne.s32.totalorder %s1916_s24, %s1666_s8  ;;  %s1671_s25 = sshll.u32 %s1757_s9, 4  ;;  %s1672_s25 = int_to_ptr.vmem [resolvable:$false] %s1671_s25 }
  0x55   : > { %s1673_s10 = scalar_lea.vmem %s1672_s25, 256  ;;  %p1674_p4 = scmp.lt.s32.totalorder %s1916_s24, %s1672_s25 }
  0x56   : > { %p1669_p2 = pnand %p1667_p12, %p1653_p0  ;;  %p1675_p13 = scmp.lt.s32.totalorder %s1673_s10, %s1666_s8 }
  0x58   : > { %p1670_p5 = pneg %p1669_p2  ;;  %p1676_p6 = por %p1675_p13, %p1674_p4 }
  0x5a   : > { %p1677_p10 = pnand %p1676_p6, %p1670_p5 }
  0x5c   : > { %1680 = shalt.err (!%p1677_p10)
}
  0x5d   : > { %1483 = dma.hbm_to_vmem [thread:$0]  (!%p1918_p11), %s1914_s17, 128, %s1916_s24, %s157_s27  }
  0x5e   : > { %176 = sbr.rel (%p1821_p8) target bundleno = 1967 (0x7af), region = 32  ;;  %s1950_s11 = sand.u32 (!%p1821_p8), 1, %s1743_s13  }
  0x5f   : > { %s1176_s21 = sshll.u32 (!%p1821_p8), %s1950_s11, 3  ;;  %s179_s28 = scalar_lea.sflag (!%p1821_p8), [#allocation3], %s1950_s11 }
  0x60   : > { %s182_s22 = scalar_lea.vmem (!%p1821_p8), [#allocation2], %s1176_s21  ;;  %p2126_p4 = scmp.ne.s32.totalorder (!%p1821_p8), %s2119_s18, 0 }
  0x65   : > { %1726 = dma.done.wait (%p2126_p4), %s179_s28, 128  }
  0x66   : > { %1728 = vsyncadd (%p2126_p4), %s179_s28, 4294967168  ;;  %p2127_p5 = scmp.eq.s32.totalorder %s1802_s16, 0 }
  0x68   : > { %1730 = dma.done.wait (%p2127_p5), [#allocation6], 8320   ;;  %p2128_p8 = pmov %p2127_p5 }
  0x69   : > { %v1758_v0 = vmov 0.0   ;;  %vm1759_vm0 = vmmov 0   ;;  %v1532_v1 = vld [vmem:[#allocation5] sm:$0xff]   ;;  %v1533_v2 = vld [vmem:[#allocation5 + $0x8] sm:$0xff]   ;;  %v1534_v3 = vld [vmem:[#allocation5 + $0x10] ss:$0 sps:$4 sm:$0xff]   ;;  %v222_v21 = vlaneseq }
  0x6a   : > { %1732 = vsyncadd (%p2128_p8), [#allocation6], 4294958976  ;;  %1311 = vmatprep.subr.bf16.mxu0 %v1758_v0  ;;  %1317 = vmatprep.mubr.msk.bf16.mxu0 %vm1759_vm0, %v1758_v0  ;;  %v1535_v4 = vld [vmem:[#allocation5 + $0x40] sm:$0xff]   ;;  %vm245_vm1 = vcmask 1043456   ;;  %v1536_v5 = vld [vmem:[#allocation5 + $0x48] sm:$0xff]   ;;  %vm241_vm2 = vcmask 326656  }
  0x6b   : > { %1321 = vmatprep.subr.bf16.mxu1 %v1758_v0  ;;  %1337 = vmatprep.mubr.msk.bf16.mxu1 %vm1759_vm0, %v1758_v0  ;;  %v215_v6 = vld [vmem:[%s182_s22] sm:$0xff]  ;;  %v247_v7 = vsel %vm245_vm1, %v1534_v3, 0  ;;  %v1539_v11 = vld [vmem:[#allocation5 + $0x60] sm:$0xff]   ;;  %v1540_v12 = vld [vmem:[#allocation5 + $0x68] sm:$0xff]   ;;  %v1989_v22 = vshrl.u32 %v222_v21, 7  ;;  %s1241_s18 = sshll.u32 %s1802_s16, 7 }
  0x6c   : > { %1312 = vmatpush3.bf16.msra.mxu0 %v1532_v1  ;;  %1322 = vmatpush3.bf16.msra.mxu1 %v1535_v4  ;;  %v216_v8 = vpack.c.bf16 %v215_v6, %v215_v6  ;;  %v1537_v9 = vld [vmem:[#allocation5 + $0x50] sm:$0xff]   ;;  %v1538_v10 = vld [vmem:[#allocation5 + $0x58] sm:$0xff]   ;;  %v1543_v15 = vld [vmem:[#allocation5 + $0x80] sm:$0xff]   ;;  %s212_s20 = scalar_lea.vmem [#allocation8], %s1176_s21  ;;  %s2068_s27 = scalar_lea.hbm %s2115_s3, %s1241_s18 }
  0x6d   : > { %1313 = vmatprep.subr.bf16.mxu0 %v1758_v0  ;;  %1323 = vmatprep.subr.bf16.mxu1 %v1758_v0  ;;  %v1541_v13 = vld [vmem:[#allocation5 + $0x70] sm:$0xff]   ;;  %v1542_v14 = vld [vmem:[#allocation5 + $0x78] sm:$0xff]   ;;  %v1544_v16 = vld [vmem:[#allocation5 + $0x88] sm:$0xff]   ;;  %v224_v23 = vsub.s32 0, %v1989_v22  ;;  %v397_v41 = vsub.s32 1, %v1989_v22  ;;  %v402_v42 = vsub.s32 2, %v1989_v22 }
  0x6e   : > { %v1545_v17 = vld [vmem:[#allocation5 + $0x90] sm:$0xff]   ;;  %v1546_v18 = vld [vmem:[#allocation5 + $0x98] sm:$0xff]   ;;  %v1547_v19 = vld [vmem:[#allocation5 + $0xa0] sm:$0xff]   ;;  %v424_v54 = vsub.s32 3, %v1989_v22  ;;  %v534_v63 = vsub.s32 4, %v1989_v22  ;;  %s1079_s17 = sshll.u32 %s212_s20, 4  ;;  %s2070_s17 = int_to_ptr.vmem [resolvable:$true] %s1079_s17 }
  0x6f   : > { %v1548_v20 = vld [vmem:[#allocation5 + $0xa8] sm:$0xff]   ;;  %v1992_v24 = vld [vmem:[#allocation7] sm:$0xff]  ;;  %v1549_v33 = vld [vmem:[#allocation5 + $0xb0] sm:$0xff]   ;;  %s1066_s29 = scalar_lea.sflag [#allocation4], %s1950_s11  ;;  %s1681_s30 = scalar_lea.vmem %s2070_s17, 128 }
  0x70   : > { %1314 = vmatpush3.bf16.msra.mxu0 %v1533_v2  ;;  %1324 = vmatpush3.bf16.msra.mxu1 %v1536_v5  ;;  %v225_v25 = vrot.slane %v1992_v24, %v224_v23  ;;  %v1550_v34 = vld [vmem:[#allocation5 + $0xb8] sm:$0xff]   ;;  %v1551_v35 = vld [vmem:[#allocation5 + $0xc0] sm:$0xff]   ;;  %v1552_v36 = vld [vmem:[#allocation5 + $0xc8] sm:$0xff]   ;;  %v398_v43 = vrot.slane %v1992_v24, %v397_v41  ;;  %v403_v44 = vrot.slane %v1992_v24, %v402_v42  ;;  %p1682_p11 = scmp.ne.s32.totalorder %s2070_s17, %s1681_s30  ;;  %p2129_p0 = scmp.ne.s32.totalorder %s2124_s6, 0 }
  0x71   : > { %1315 = vmatprep.subr.bf16.mxu0 %v1758_v0  ;;  %1325 = vmatprep.subr.bf16.mxu1 %v1758_v0  ;;  %v1553_v37 = vld [vmem:[#allocation5 + $0xd0] sm:$0xff]   ;;  %v1554_v38 = vld [vmem:[#allocation5 + $0xd8] sm:$0xff]   ;;  %v1555_v39 = vld [vmem:[#allocation5 + $0xe0] sm:$0xff]   ;;  %v425_v55 = vrot.slane %v1992_v24, %v424_v54  ;;  %v535_v1 = vrot.slane %v1992_v24, %v534_v63  ;;  %s1760_s16 = smov [#allocation8]  }
  0x72   : > { %v1556_v40 = vld [vmem:[#allocation5 + $0xe8] sm:$0xff]   ;;  %v1557_v52 = vld [vmem:[#allocation5 + $0xf0] sm:$0xff]   ;;  %v1558_v53 = vld [vmem:[#allocation5 + $0xf8] sm:$0xff]   ;;  %p1683_p1 = pnand %p1682_p11, %p2129_p0  ;;  %s1685_s23 = sshll.u32 %s1760_s16, 4  ;;  %s1686_s23 = int_to_ptr.vmem [resolvable:$false] %s1685_s23 }
  0x73   : > { %v1569_v21 = vld [vmem:[#allocation5 + $0x150] sm:$0xff]   ;;  %v1570_v23 = vld [vmem:[#allocation5 + $0x158] sm:$0xff]   ;;  %s1687_s5 = scalar_lea.vmem %s1686_s23, 256  ;;  %p1688_p7 = scmp.lt.s32.totalorder %s2070_s17, %s1686_s23 }
  0x74   : > { %1316 = vmatpush3.bf16.msra.mxu0 %v247_v7  ;;  %1326 = vmatpush3.bf16.msra.mxu1 %v1537_v9  ;;  %v1559_v7 = vld [vmem:[#allocation5 + $0x100] sm:$0xff]   ;;  %v1561_v9 = vld [vmem:[#allocation5 + $0x110] sm:$0xff]   ;;  %v1590_v54 = vld [vmem:[#allocation5 + $0x1b8] sm:$0xff]   ;;  %p1684_p3 = pneg %p1683_p1  ;;  %p1689_p9 = scmp.lt.s32.totalorder %s1687_s5, %s1681_s30 }
  0x75   : > { %1341 = vmatprep.subr.bf16.mxu0 %v1758_v0  ;;  %1327 = vmatprep.subr.bf16.mxu1 %v1758_v0 }
  0x76   : > { %p1690_p12 = por %p1689_p9, %p1688_p7 }
  0x77   : > { %1318 = vmatmul.mubr.msk.bf16.vlgmr.msra.gmra.mrb[0].mxu0 %vm241_vm2, %v216_v8  ;;  %v1560_v8 = vld [vmem:[#allocation5 + $0x108] sm:$0xff]  }
  0x78   : > { %1357 = vmatprep.mubr.msk.bf16.mxu0 %vm1759_vm0, %v1758_v0  ;;  %1328 = vmatpush3.bf16.msra.mxu1 %v1538_v10  ;;  %v1562_v10 = vld [vmem:[#allocation5 + $0x118] sm:$0xff]   ;;  %p1691_p2 = pnand %p1690_p12, %p1684_p3 }
  0x79   : > { %1329 = vmatprep.subr.bf16.mxu1 %v1758_v0  ;;  %1342 = vmatpush3.bf16.msra.mxu0 %v1543_v15  ;;  %v1563_v15 = vld [vmem:[#allocation5 + $0x120] sm:$0xff]  }
  0x7a   : > { %1343 = vmatprep.subr.bf16.mxu0 %v1758_v0 }
  0x7c   : > { %1330 = vmatpush3.bf16.msra.mxu1 %v1539_v11 }
  0x7d   : > { %1331 = vmatprep.subr.bf16.mxu1 %v1758_v0  ;;  %1344 = vmatpush3.bf16.msra.mxu0 %v1544_v16  ;;  %v1564_v16 = vld [vmem:[#allocation5 + $0x128] sm:$0xff]  }
  0x7e   : > { %1345 = vmatprep.subr.bf16.mxu0 %v1758_v0 }
  0x80   : > { %1332 = vmatpush3.bf16.msra.mxu1 %v1540_v12 }
  0x81   : > { %1333 = vmatprep.subr.bf16.mxu1 %v1758_v0  ;;  %1346 = vmatpush3.bf16.msra.mxu0 %v1545_v17  ;;  %v1565_v17 = vld [vmem:[#allocation5 + $0x130] sm:$0xff]  }
  0x82   : > { %1347 = vmatprep.subr.bf16.mxu0 %v1758_v0 }
  0x84   : > { %1334 = vmatpush3.bf16.msra.mxu1 %v1541_v13 }
  0x85   : > { %1335 = vmatprep.subr.bf16.mxu1 %v1758_v0  ;;  %1348 = vmatpush3.bf16.msra.mxu0 %v1546_v18  ;;  %v1566_v18 = vld [vmem:[#allocation5 + $0x138] sm:$0xff]  }
  0x86   : > { %1349 = vmatprep.subr.bf16.mxu0 %v1758_v0 }
  0x88   : > { %1336 = vmatpush3.bf16.msra.mxu1 %v1542_v14 }
  0x89   : > { %1361 = vmatprep.subr.bf16.mxu1 %v1758_v0  ;;  %1350 = vmatpush3.bf16.msra.mxu0 %v1547_v19  ;;  %v1567_v19 = vld [vmem:[#allocation5 + $0x140] sm:$0xff]  }
  0x8a   : > { %1351 = vmatprep.subr.bf16.mxu0 %v1758_v0 }
  0x8d   : > { %1352 = vmatpush3.bf16.msra.mxu0 %v1548_v20  ;;  %v1568_v20 = vld [vmem:[#allocation5 + $0x148] sm:$0xff]  }
  0x8e   : > { %1353 = vmatprep.subr.bf16.mxu0 %v1758_v0 }
  0x91   : > { %1354 = vmatpush3.bf16.msra.mxu0 %v1549_v33  ;;  %v1583_v33 = vld [vmem:[#allocation5 + $0x180] sm:$0xff]  }
  0x92   : > { %1355 = vmatprep.subr.bf16.mxu0 %v1758_v0 }
  0x95   : > { %1356 = vmatpush3.bf16.msra.mxu0 %v1550_v34  ;;  %v1584_v34 = vld [vmem:[#allocation5 + $0x188] sm:$0xff]  }
  0x96   : > { %1381 = vmatprep.subr.bf16.mxu0 %v1758_v0 }
 0x14a   : > { %v283_v26 = vpop.f32.mrb[0].mxu0 }
 0x14b   : > { %v284_v27 = vadd.f32 %v283_v26, %v225_v25  ;;  %v1319_v28 = vpop.f32.mrb[1].mxu0  ;;  %v1571_v25 = vld [vmem:[#allocation5 + $0x160] sm:$0xff]   ;;  %v1572_v26 = vld [vmem:[#allocation5 + $0x168] sm:$0xff]  }
 0x14c   : > { %v286_v29 = vpop.f32.mrb[2].mxu0 }
 0x14d   : > { %v289_v30 = vmax.f32 %v284_v27, 0.0  ;;  %v1320_v31 = vpop.f32.mrb[3].mxu0  ;;  %v1573_v27 = vld [vmem:[#allocation5 + $0x170] sm:$0xff]  }
 0x14f   : > { %v290_v32 = vpack.c.bf16 %v289_v30, %v289_v30 }
 0x151   : > { %1338 = vmatmul.mubr.bf16.vlgmr.msra.gmra.mrb[0].mxu1 %v290_v32  ;;  %v1574_v32 = vld [vmem:[#allocation5 + $0x178] sm:$0xff]  }
 0x152   : > { %1377 = vmatprep.mubr.msk.bf16.mxu1 %vm1759_vm0, %v1758_v0  ;;  %1362 = vmatpush3.bf16.msra.mxu1 %v1551_v35  ;;  %v1585_v35 = vld [vmem:[#allocation5 + $0x190] sm:$0xff]  }
 0x153   : > { %1363 = vmatprep.subr.bf16.mxu1 %v1758_v0 }
 0x156   : > { %1364 = vmatpush3.bf16.msra.mxu1 %v1552_v36  ;;  %v1586_v36 = vld [vmem:[#allocation5 + $0x198] sm:$0xff]  }
 0x157   : > { %1365 = vmatprep.subr.bf16.mxu1 %v1758_v0 }
 0x15a   : > { %1366 = vmatpush3.bf16.msra.mxu1 %v1553_v37  ;;  %v1587_v37 = vld [vmem:[#allocation5 + $0x1a0] sm:$0xff]  }
 0x15b   : > { %1367 = vmatprep.subr.bf16.mxu1 %v1758_v0 }
 0x15e   : > { %1368 = vmatpush3.bf16.msra.mxu1 %v1554_v38  ;;  %v1588_v38 = vld [vmem:[#allocation5 + $0x1a8] sm:$0xff]  }
 0x15f   : > { %1369 = vmatprep.subr.bf16.mxu1 %v1758_v0 }
 0x162   : > { %1370 = vmatpush3.bf16.msra.mxu1 %v1555_v39 }
 0x163   : > { %1371 = vmatprep.subr.bf16.mxu1 %v1758_v0 }
 0x166   : > { %1372 = vmatpush3.bf16.msra.mxu1 %v1556_v40 }
 0x167   : > { %1373 = vmatprep.subr.bf16.mxu1 %v1758_v0 }
 0x16a   : > { %1374 = vmatpush3.bf16.msra.mxu1 %v1557_v52  ;;  %v1582_v52 = vld [vmem:[#allocation5 + $0x1f8] sm:$0xff]  }
 0x16b   : > { %1375 = vmatprep.subr.bf16.mxu1 %v1758_v0 }
 0x16e   : > { %1376 = vmatpush3.bf16.msra.mxu1 %v1558_v53  ;;  %v1589_v53 = vld [vmem:[#allocation5 + $0x1b0] sm:$0xff]  }
 0x16f   : > { %1401 = vmatprep.subr.bf16.mxu1 %v1758_v0 }
 0x224   : > { %v389_v45 = vpop.f32.mrb[0].mxu1 }
 0x225   : > { %v399_v46 = vmul.f32 %v398_v43, %v389_v45  ;;  %v1339_v47 = vpop.f32.mrb[1].mxu1  ;;  %v1575_v43 = vld [vmem:[#allocation5 + $0x1c0] sm:$0xff]  }
 0x226   : > { %v392_v48 = vpop.f32.mrb[2].mxu1  ;;  %v1577_v47 = vld [vmem:[#allocation5 + $0x1d0] sm:$0xff]  }
 0x227   : > { %v2009_v49 = vadd.f32 %v403_v44, %v399_v46  ;;  %v1340_v50 = vpop.f32.mrb[3].mxu1  ;;  %v1576_v46 = vld [vmem:[#allocation5 + $0x1c8] sm:$0xff]   ;;  %v1578_v48 = vld [vmem:[#allocation5 + $0x1d8] sm:$0xff]  }
 0x228   : > { %v1580_v50 = vld [vmem:[#allocation5 + $0x1e8] sm:$0xff]  }
 0x229   : > { %v405_v51 = vpack.c.bf16 %v2009_v49, %v2009_v49 }
 0x22b   : > { %1358 = vmatmul.mubr.bf16.vlgmr.msra.gmra.mrb[4].mxu0 %v405_v51  ;;  %v1581_v51 = vld [vmem:[#allocation5 + $0x1f0] sm:$0xff]  }
 0x22c   : > { %1397 = vmatprep.mubr.msk.bf16.mxu0 %vm1759_vm0, %v1758_v0  ;;  %1382 = vmatpush3.bf16.msra.mxu0 %v1559_v7 }
 0x22d   : > { %1383 = vmatprep.subr.bf16.mxu0 %v1758_v0 }
 0x230   : > { %1384 = vmatpush3.bf16.msra.mxu0 %v1560_v8 }
 0x231   : > { %1385 = vmatprep.subr.bf16.mxu0 %v1758_v0 }
 0x234   : > { %1386 = vmatpush3.bf16.msra.mxu0 %v1561_v9 }
 0x235   : > { %1387 = vmatprep.subr.bf16.mxu0 %v1758_v0 }
 0x238   : > { %1388 = vmatpush3.bf16.msra.mxu0 %v1562_v10 }
 0x239   : > { %1389 = vmatprep.subr.bf16.mxu0 %v1758_v0 }
 0x23c   : > { %1390 = vmatpush3.bf16.msra.mxu0 %v1563_v15 }
 0x23d   : > { %1391 = vmatprep.subr.bf16.mxu0 %v1758_v0 }
 0x240   : > { %1392 = vmatpush3.bf16.msra.mxu0 %v1564_v16 }
 0x241   : > { %1393 = vmatprep.subr.bf16.mxu0 %v1758_v0 }
 0x244   : > { %1394 = vmatpush3.bf16.msra.mxu0 %v1565_v17 }
 0x245   : > { %1395 = vmatprep.subr.bf16.mxu0 %v1758_v0 }
 0x248   : > { %1396 = vmatpush3.bf16.msra.mxu0 %v1566_v18 }
 0x249   : > { %1421 = vmatprep.subr.bf16.mxu0 %v1758_v0 }
 0x2fe   : > { %v508_v56 = vpop.f32.mrb[4].mxu0 }
 0x2ff   : > { %v509_v57 = vadd.f32 %v508_v56, %v425_v55  ;;  %v1359_v58 = vpop.f32.mrb[5].mxu0  ;;  %v758_v55 = vsub.s32 5, %v1989_v22 }
 0x300   : > { %v511_v59 = vpop.f32.mrb[6].mxu0 }
 0x301   : > { %v514_v60 = vmax.f32 %v509_v57, 0.0  ;;  %v1360_v61 = vpop.f32.mrb[7].mxu0  ;;  %v759_v56 = vrot.slane %v1992_v24, %v758_v55 }
 0x303   : > { %v515_v62 = vpack.c.bf16 %v514_v60, %v514_v60 }
 0x305   : > { %1378 = vmatmul.mubr.bf16.vlgmr.msra.gmra.mrb[4].mxu1 %v515_v62 }
 0x306   : > { %1417 = vmatprep.mubr.msk.bf16.mxu1 %vm1759_vm0, %v1758_v0  ;;  %1402 = vmatpush3.bf16.msra.mxu1 %v1567_v19 }
 0x307   : > { %1403 = vmatprep.subr.bf16.mxu1 %v1758_v0 }
 0x30a   : > { %1404 = vmatpush3.bf16.msra.mxu1 %v1568_v20 }
 0x30b   : > { %1405 = vmatprep.subr.bf16.mxu1 %v1758_v0 }
 0x30e   : > { %1406 = vmatpush3.bf16.msra.mxu1 %v1569_v21 }
 0x30f   : > { %1407 = vmatprep.subr.bf16.mxu1 %v1758_v0 }
 0x312   : > { %1408 = vmatpush3.bf16.msra.mxu1 %v1570_v23 }
 0x313   : > { %1409 = vmatprep.subr.bf16.mxu1 %v1758_v0 }
 0x316   : > { %1410 = vmatpush3.bf16.msra.mxu1 %v1571_v25 }
 0x317   : > { %1411 = vmatprep.subr.bf16.mxu1 %v1758_v0 }
 0x31a   : > { %1412 = vmatpush3.bf16.msra.mxu1 %v1572_v26 }
 0x31b   : > { %1413 = vmatprep.subr.bf16.mxu1 %v1758_v0 }
 0x31e   : > { %1414 = vmatpush3.bf16.msra.mxu1 %v1573_v27 }
 0x31f   : > { %1415 = vmatprep.subr.bf16.mxu1 %v1758_v0 }
 0x322   : > { %1416 = vmatpush3.bf16.msra.mxu1 %v1574_v32 }
 0x323   : > { %1441 = vmatprep.subr.bf16.mxu1 %v1758_v0 }
 0x3d8   : > { %v618_v2 = vpop.f32.mrb[4].mxu1 }
 0x3d9   : > { %v619_v3 = vadd.f32 %v618_v2, %v535_v1  ;;  %v1379_v4 = vpop.f32.mrb[5].mxu1 }
 0x3da   : > { %v621_v5 = vpop.f32.mrb[6].mxu1  ;;  %v868_v4 = vsub.s32 6, %v1989_v22 }
 0x3db   : > { %624 = vmax.xlane.f32.xlu0 %v619_v3  ;;  %v1380_v6 = vpop.f32.mrb[7].mxu1 }
 0x3dc   : > { %v869_v5 = vrot.slane %v1992_v24, %v868_v4 }
 0x468   : > { %v625_v11 = vpop.xlane.xlu0 %624 }
 0x469   : > { %v626_v12 = vsub.f32 %v619_v3, %v625_v11 }
 0x46b   : > { %v627_v13 = vmul.f32 1.442695, %v626_v12 }
 0x46d   : > { %1591 = vpow2.f32 %v627_v13 }
 0x477   : > { %v1592_v14 = vpop.eup %1591 }
 0x478   : > { %629 = vadd.xlane.f32.xlu0 %v1592_v14 }
 0x505   : > { %v630_v28 = vpop.xlane.xlu0 %629 }
 0x506   : > { %1593 = vrcp.f32 %v630_v28 }
 0x510   : > { %v1594_v29 = vpop.eup %1593 }
 0x511   : > { %v632_v30 = vmul.f32 %v1594_v29, %v1592_v14 }
 0x513   : > { %v633_v31 = vpack.c.bf16 %v632_v30, %v632_v30 }
 0x515   : > { %1398 = vmatmul.mubr.bf16.vlgmr.msra.gmra.mrb[8].mxu0 %v633_v31 }
 0x516   : > { %1437 = vmatprep.mubr.msk.bf16.mxu0 %vm1759_vm0, %v1758_v0  ;;  %1422 = vmatpush3.bf16.msra.mxu0 %v1583_v33 }
 0x517   : > { %1423 = vmatprep.subr.bf16.mxu0 %v1758_v0 }
 0x51a   : > { %1424 = vmatpush3.bf16.msra.mxu0 %v1584_v34 }
 0x51b   : > { %1425 = vmatprep.subr.bf16.mxu0 %v1758_v0 }
 0x51e   : > { %1426 = vmatpush3.bf16.msra.mxu0 %v1585_v35 }
 0x51f   : > { %1427 = vmatprep.subr.bf16.mxu0 %v1758_v0 }
 0x522   : > { %1428 = vmatpush3.bf16.msra.mxu0 %v1586_v36 }
 0x523   : > { %1429 = vmatprep.subr.bf16.mxu0 %v1758_v0 }
 0x526   : > { %1430 = vmatpush3.bf16.msra.mxu0 %v1587_v37 }
 0x527   : > { %1431 = vmatprep.subr.bf16.mxu0 %v1758_v0 }
 0x52a   : > { %1432 = vmatpush3.bf16.msra.mxu0 %v1588_v38 }
 0x52b   : > { %1433 = vmatprep.subr.bf16.mxu0 %v1758_v0 }
 0x52e   : > { %1434 = vmatpush3.bf16.msra.mxu0 %v1589_v53 }
 0x52f   : > { %1435 = vmatprep.subr.bf16.mxu0 %v1758_v0 }
 0x532   : > { %1436 = vmatpush3.bf16.msra.mxu0 %v1590_v54 }
 0x5e8   : > { %v732_v39 = vpop.f32.mrb[8].mxu0 }
 0x5e9   : > { %v738_v40 = vmul.f32 %v732_v39, %v2009_v49  ;;  %v1399_v41 = vpop.f32.mrb[9].mxu0  ;;  %v1579_v49 = vld [vmem:[#allocation5 + $0x1e0] sm:$0xff]  }
 0x5ea   : > { %v735_v42 = vpop.f32.mrb[10].mxu0 }
 0x5eb   : > { %v739_v44 = vpack.c.bf16 %v738_v40, %v738_v40  ;;  %v1400_v45 = vpop.f32.mrb[11].mxu0 }
 0x5ed   : > { %1418 = vmatmul.mubr.bf16.vlgmr.msra.gmra.mrb[8].mxu1 %v739_v44 }
 0x5ee   : > { %1442 = vmatpush3.bf16.msra.mxu1 %v1575_v43  ;;  %1457 = vmatprep.mubr.msk.bf16.mxu1 %vm1759_vm0, %v1758_v0 }
 0x5ef   : > { %1443 = vmatprep.subr.bf16.mxu1 %v1758_v0 }
 0x5f2   : > { %1444 = vmatpush3.bf16.msra.mxu1 %v1576_v46 }
 0x5f3   : > { %1445 = vmatprep.subr.bf16.mxu1 %v1758_v0 }
 0x5f6   : > { %1446 = vmatpush3.bf16.msra.mxu1 %v1577_v47 }
 0x5f7   : > { %1447 = vmatprep.subr.bf16.mxu1 %v1758_v0 }
 0x5fa   : > { %1448 = vmatpush3.bf16.msra.mxu1 %v1578_v48 }
 0x5fb   : > { %1449 = vmatprep.subr.bf16.mxu1 %v1758_v0 }
 0x5fe   : > { %1450 = vmatpush3.bf16.msra.mxu1 %v1579_v49 }
 0x5ff   : > { %1451 = vmatprep.subr.bf16.mxu1 %v1758_v0 }
 0x602   : > { %1452 = vmatpush3.bf16.msra.mxu1 %v1580_v50 }
 0x603   : > { %1453 = vmatprep.subr.bf16.mxu1 %v1758_v0 }
 0x606   : > { %1454 = vmatpush3.bf16.msra.mxu1 %v1581_v51 }
 0x607   : > { %1455 = vmatprep.subr.bf16.mxu1 %v1758_v0 }
 0x60a   : > { %1456 = vmatpush3.bf16.msra.mxu1 %v1582_v52 }
 0x60d   : > { %1458 = vmatmul.mubr.bf16.vlgmr.msra.gmra.mrb[12].mxu1 %v633_v31 }
 0x6c0   : > { %v842_v57 = vpop.f32.mrb[8].mxu1 }
 0x6c1   : > { %v843_v58 = vadd.f32 %v842_v57, %v759_v56  ;;  %v1419_v59 = vpop.f32.mrb[9].mxu1 }
 0x6c2   : > { %v845_v60 = vpop.f32.mrb[10].mxu1 }
 0x6c3   : > { %v848_v61 = vmax.f32 %v843_v58, 0.0  ;;  %v1420_v62 = vpop.f32.mrb[11].mxu1 }
 0x6c5   : > { %v849_v63 = vpack.c.bf16 %v848_v61, %v848_v61 }
 0x6c7   : > { %1438 = vmatmul.mubr.bf16.vlgmr.msra.gmra.mrb[12].mxu0 %v849_v63 }
 0x6e0   : > { %v1057_v1 = vpop.f32.mrb[12].mxu1 }
 0x6e1   : > { %v1459_v2 = vpop.f32.mrb[13].mxu1 }
 0x6e2   : > { %v1060_v3 = vpop.f32.mrb[14].mxu1 }
 0x6e3   : > { %v1460_v0 = vpop.f32.mrb[15].mxu1 }
 0x79a   : > { %v952_v6 = vpop.f32.mrb[12].mxu0 }
 0x79b   : > { %v953_v7 = vadd.f32 %v952_v6, %v869_v5  ;;  %v1439_v8 = vpop.f32.mrb[13].mxu0 }
 0x79c   : > { %v955_v9 = vpop.f32.mrb[14].mxu0 }
 0x79d   : > { %v958_v10 = vmax.f32 %v953_v7, 0.0  ;;  %v1440_v11 = vpop.f32.mrb[15].mxu0 }
 0x79f   : > { %v1063_v12 = vadd.f32 %v1057_v1, %v958_v10 }
 0x7a1   : > { %1064 = vst [vmem:[%s212_s20] sm:$0xff] %v1063_v12 }
 0x7a2   : > { %1694 = shalt.err (!%p1691_p2)
}
 0x7a3   : > { %s1695_s8 = scalar_lea.hbm %s2068_s27, 128  ;;  %s1699_s10 = scalar_lea.hbm %s2115_s3, 256 }
 0x7a4   : > { %p1696_p13 = scmp.ne.s32.totalorder %s2068_s27, %s1695_s8  ;;  %p1700_p4 = scmp.lt.u32.totalorder %s2068_s27, %s2115_s3 }
 0x7a5   : > { %p1701_p5 = scmp.lt.u32.totalorder %s1699_s10, %s1695_s8  ;;  %p1703_p11 = scmp.lt.u32.totalorder %s1695_s8, %s2068_s27 }
 0x7a6   : > { %p1697_p6 = pnand %p1696_p13, %p2129_p0 }
 0x7a7   : > { %p1702_p8 = por %p1701_p5, %p1700_p4 }
 0x7a8   : > { %p1698_p10 = pneg %p1697_p6 }
 0x7a9   : > { %p1704_p1 = por %p1703_p11, %p1702_p8 }
 0x7ab   : > { %p1705_p3 = pnand %p1704_p1, %p1698_p10 }
 0x7ad   : > { %1708 = shalt.err (!%p1705_p3)
}
 0x7ae   : > { %1471 = dma.vmem_to_hbm [thread:$0]  (%p2129_p0), %s2070_s17, 128, %s2068_s27, %s1066_s29  }
 0x7af PF: > { %s1091_s28 = sand.u32 1, %s1739_s12   ;;  %p2130_p7 = scmp.ne.s32.totalorder %s2120_s19, 0 }
 0x7b0   : > { %p2131_p9 = scmp.ge.s32.totalorder %s1751_s15, 2  ;;  %s1092_s22 = scalar_lea.sflag [#allocation4], %s1091_s28 }
 0x7b2   : > { %p1485_p12 = pnand %p2131_p9, %p2130_p7 }
 0x7b4   : > { %1734 = dma.done.wait (!%p1485_p12), %s1092_s22, 128  }
 0x7b5   : > { %1736 = vsyncadd (!%p1485_p12), %s1092_s22, 4294967168  ;;  %p17_p2 = scmp.ge.s32.totalorder %s1891_s4, 4   ;;  %s2132_s12 = smov %s1743_s13 }
 0x7b6   : > { %s2133_s13 = smov %s1747_s14  ;;  %s2134_s14 = smov %s1907_s7 }
 0x7b7   : > { %s2135_s15 = smov %s1891_s4  ;;  %19 = sbr.rel (!%p17_p2) target bundleno = 6 (0x6), region = 85 }
 0x7be   :  { %1097 = vsyncpa [#allocation3], 1 }
 0x7bf   :  { %1099 = vsyncpa [#allocation3 + $0x1], 1 }
 0x7c0   :  { %1100 = vsyncpa [#allocation6], 1 }
 0x7c1   :  { %1101 = vsyncpa [#allocation4], 1 }
 0x7c2   :  { %1103 = vsyncpa [#allocation4 + $0x1], 1 }

</bundles_post_ra>
